<compile_context>
chip_gen: v7x
topology: tpu7x:2x2x1
jax: 0.10.0
libtpu: 0.0.40
codegen_flags: <defaults>
</compile_context>

<pallas_src>
import functools
import math

import jax
import jax.numpy as jnp
from jax import lax
from jax.experimental import pallas as pl
from jax.experimental.pallas import tpu as pltpu


def _xlogx(x):
    return x * math.log(x) if x > 0.0 else 0.0


def _ceil_div(a, b):
    return -(-a // b)


def _vmem_capacity_bytes():
    """Per-TensorCore VMEM capacity, with a generation-aware fallback."""
    try:
        return int(pltpu.get_tpu_info().vmem_capacity_bytes)
    except Exception:
        pass
    try:
        kind = jax.devices()[0].device_kind.lower()
        if "v7" in kind:
            return 64 * 1024 * 1024
    except Exception:
        pass
    return 128 * 1024 * 1024  # v5e / v6e


def _row_tile(vocab, in_itemsize):
    """Row tile: ~12 MiB pred buffer, bounded by the full pipeline footprint."""
    vmem = _vmem_capacity_bytes()
    # Per-row VMEM cost: double-buffered input block + in-kernel f32 upcast
    # and select temporaries (matters most for bf16 inputs on 64-MiB v7x).
    bytes_per_row = vocab * (3 * in_itemsize + 4)
    budget_rows = (vmem // 2) // max(1, bytes_per_row)
    # ~12 MiB per (single) pred input buffer keeps per-step overhead << DMA time.
    target_rows = (12 << 20) // max(1, vocab * in_itemsize)
    tn = min(budget_rows, target_rows, 8192)
    return int(max(8, (tn // 8) * 8))


def _loss_ls_kernel(pred_ref, tgt_ref, msk_ref, out_ref, *, off_val, confidence,
                    c_const):
    pred = pred_ref[...]                                  # (tn, V) log-probs, native dtype
    tgt = tgt_ref[...]                                    # (tn, 1) int32 target index
    msk = msk_ref[...]                                    # (tn, 1) float32 mask

    tn, vocab = pred.shape
    cols = lax.broadcasted_iota(jnp.int32, (tn, vocab), 1)

    # labels . pred, folded so only row-level accumulators are f32:
    #   off_val * sum_j pred_j + (confidence - off_val) * pred[target]
    sum_all = jnp.sum(pred.astype(jnp.float32), axis=1, keepdims=True)      # (tn, 1)
    sel = jnp.where(cols == tgt, pred, jnp.zeros((), pred.dtype))           # 1 nonzero/row
    pred_tgt = jnp.sum(sel, axis=1, keepdims=True).astype(jnp.float32)      # exact
    row_dot = (jnp.float32(off_val) * sum_all
               + jnp.float32(confidence - off_val) * pred_tgt)              # (tn, 1)

    row_loss = jnp.float32(c_const) - row_dot                               # (tn, 1)
    # where, not multiply: boundary blocks may carry stale-VMEM garbage rows
    # (their padded mask is exactly 0) and 0 * NaN would otherwise poison the sum.
    masked = jnp.where(msk > 0.0, row_loss * msk, jnp.float32(0.0))
    out_ref[...] = jnp.sum(masked, keepdims=True)                           # (1, 1)


def loss_with_ls(prediction, target, mask, *, smooth, tn=None):
    """prediction: (B, W, V) log-probs; target: (B, W) int; mask: (B, W)."""
    B, W, V = prediction.shape
    N = B * W
    confidence = 1.0 - smooth
    off_val = smooth / (V - 1)
    # sum_j labels_j * log(labels_j), with 0*log(0) := 0 (smooth == 0 safe).
    c_const = (V - 1) * _xlogx(off_val) + _xlogx(confidence)

    in_itemsize = jnp.dtype(prediction.dtype).itemsize
    n_pad8 = ((N + 7) // 8) * 8
    if tn is None:
        tn = _row_tile(V, in_itemsize)
    tn = int(min(tn, n_pad8))
    tn = max(8, (tn // 8) * 8)

    grid_n = _ceil_div(N, tn)
    # v7x has 2 TensorCores sharing HBM: prefer an even, balanced step count.
    if grid_n >= 2 and grid_n % 2 == 1:
        tn2 = max(8, ((_ceil_div(N, grid_n + 1) + 7) // 8) * 8)
        if _ceil_div(N, tn2) % 2 == 0:
            tn = tn2
            grid_n = _ceil_div(N, tn)
    n_span = grid_n * tn

    # pred is NOT padded (no extra full HBM pass); only the tiny per-row side
    # arrays are padded so out-of-range rows carry mask == 0.
    pred2d = prediction.reshape(N, V)
    tgt2d = target.reshape(N, 1).astype(jnp.int32)
    msk2d = mask.reshape(N, 1).astype(jnp.float32)
    if n_span != N:
        tgt2d = jnp.pad(tgt2d, ((0, n_span - N), (0, 0)))
        msk2d = jnp.pad(msk2d, ((0, n_span - N), (0, 0)))

    # VMEM: double-buffered pred stream + f32 upcast / select temporaries +
    # lane-padded side blocks + headroom, capped below physical VMEM.
    needed = (2 * tn * V * in_itemsize
              + tn * V * (4 + in_itemsize)
              + 4 * tn * 128 * 4
              + (4 << 20))
    vmem_cap = _vmem_capacity_bytes()
    vmem_limit = int(min(int(vmem_cap * 0.9), max(32 << 20, needed)))

    kernel = functools.partial(_loss_ls_kernel, off_val=off_val,
                               confidence=confidence, c_const=c_const)

    partials = pl.pallas_call(
        kernel,
        out_shape=jax.ShapeDtypeStruct((grid_n, 1, 1), jnp.float32),
        grid=(grid_n,),
        in_specs=[
            pl.BlockSpec((tn, V), lambda i: (i, 0)),
            pl.BlockSpec((tn, 1), lambda i: (i, 0)),
            pl.BlockSpec((tn, 1), lambda i: (i, 0)),
        ],
        out_specs=pl.BlockSpec((None, 1, 1), lambda i: (i, 0, 0)),
        compiler_params=pltpu.CompilerParams(
            dimension_semantics=("parallel",),
            vmem_limit_bytes=vmem_limit),
    )(pred2d, tgt2d, msk2d)

    numer = jnp.sum(partials)
    denom = jnp.sum(mask.astype(jnp.float32))
    # NOTE: like the reference module, no guard against mask.sum() == 0.
    return numer / denom


def _reference(prediction, target, mask, *, smooth):
    B, W, V = prediction.shape
    confidence = 1.0 - smooth
    pred = prediction.reshape(-1, V).astype(jnp.float32)
    tgt = target.reshape(-1)
    msk = mask.reshape(-1).astype(jnp.float32)
    labels = jnp.full_like(pred, smooth / (V - 1))
    labels = labels.at[jnp.arange(pred.shape[0]), tgt].set(confidence)
    loss = labels * (jnp.log(labels) - pred)
    return (loss.sum(1) * msk).sum() / msk.sum()


if __name__ == "__main__":
    key = jax.random.PRNGKey(0)
    smooth = 0.1

    # Case 1: small, tile-aligned shapes.
    B, W, V = 2, 8, 32
    k1, k2, k3 = jax.random.split(key, 3)
    logits = jax.random.normal(k1, (B, W, V), dtype=jnp.float32)
    prediction = jax.nn.log_softmax(logits, axis=-1)   # KLDivLoss expects log-probs
    target = jax.random.randint(k2, (B, W), 0, V, dtype=jnp.int32)
    mask = (jax.random.uniform(k3, (B, W)) > 0.3).astype(jnp.float32)
    mask = mask.at[0, 0].set(1.0)  # ensure mask.sum() > 0

    out = loss_with_ls(prediction, target, mask, smooth=smooth)
    out = jax.block_until_ready(out)
    ref = _reference(prediction, target, mask, smooth=smooth)
    assert jnp.allclose(out, ref, rtol=1e-4, atol=1e-4), (out, ref)

    # Case 2: ragged row count (N = 15 not a multiple of the tile) to exercise
    # the un-padded boundary block + masked tail path.
    B2, W2 = 3, 5
    k4, k5, k6 = jax.random.split(jax.random.PRNGKey(1), 3)
    logits2 = jax.random.normal(k4, (B2, W2, V), dtype=jnp.float32)
    prediction2 = jax.nn.log_softmax(logits2, axis=-1)
    target2 = jax.random.randint(k5, (B2, W2), 0, V, dtype=jnp.int32)
    mask2 = (jax.random.uniform(k6, (B2, W2)) > 0.3).astype(jnp.float32)
    mask2 = mask2.at[0, 0].set(1.0)

    out2 = loss_with_ls(prediction2, target2, mask2, smooth=smooth, tn=8)
    out2 = jax.block_until_ready(out2)
    ref2 = _reference(prediction2, target2, mask2, smooth=smooth)
    assert jnp.allclose(out2, ref2, rtol=1e-4, atol=1e-4), (out2, ref2)

    print("KERNEL_OK")
</pallas_src>

<mosaic_0001>
module attributes {stable_mosaic.version = 11 : i64} {
  func.func @_loss_ls_kernel(%arg0: i32, %arg1: memref<16x32xf32, #tpu.memory_space<vmem>>, %arg2: memref<16x1xi32, #tpu.memory_space<vmem>>, %arg3: memref<16x1xf32, #tpu.memory_space<vmem>>, %arg4: memref<1x1x1xf32, #tpu.memory_space<vmem>>) attributes {dimension_semantics = [#tpu.dimension_semantics<parallel>], iteration_bounds = array<i64: 1>, scalar_prefetch = 0 : i64, scratch_operands = 0 : i64, tpu.core_type = #tpu.core_type<tc>, window_params = [{transform_indices = @transform_0, window_bounds = array<i64: 16, 32>}, {transform_indices = @transform_1, window_bounds = array<i64: 16, 1>}, {transform_indices = @transform_2, window_bounds = array<i64: 16, 1>}, {transform_indices = @transform_3, window_bounds = array<i64: 1, 1, 1>}]} {
    %c0 = arith.constant 0 : index
    %c0_0 = arith.constant 0 : index
    %0 = vector.load %arg1[%c0, %c0_0] : memref<16x32xf32, #tpu.memory_space<vmem>>, vector<16x32xf32>
    %c0_1 = arith.constant 0 : index
    %c0_2 = arith.constant 0 : index
    %1 = vector.load %arg2[%c0_1, %c0_2] : memref<16x1xi32, #tpu.memory_space<vmem>>, vector<16x1xi32>
    %c0_3 = arith.constant 0 : index
    %c0_4 = arith.constant 0 : index
    %2 = vector.load %arg3[%c0_3, %c0_4] : memref<16x1xf32, #tpu.memory_space<vmem>>, vector<16x1xf32>
    %3 = tpu.iota {dimensions = array<i32: 1>} : vector<16x32xi32>
    %cst = arith.constant dense<0.000000e+00> : vector<16xf32>
    %4 = vector.multi_reduction <add>, %0, %cst [1] : vector<16x32xf32> to vector<16xf32>
    %5 = vector.shape_cast %4 : vector<16xf32> to vector<16x1xf32>
    %6 = vector.broadcast %1 : vector<16x1xi32> to vector<16x32xi32>
    %7 = arith.cmpi eq, %3, %6 : vector<16x32xi32>
    %cst_5 = arith.constant 0.000000e+00 : f32
    %8 = vector.broadcast %cst_5 : f32 to vector<16x32xf32>
    %9 = arith.select %7, %0, %8 : vector<16x32xi1>, vector<16x32xf32>
    %cst_6 = arith.constant dense<0.000000e+00> : vector<16xf32>
    %10 = vector.multi_reduction <add>, %9, %cst_6 [1] : vector<16x32xf32> to vector<16xf32>
    %11 = vector.shape_cast %10 : vector<16xf32> to vector<16x1xf32>
    %cst_7 = arith.constant 0.0032258064 : f32
    %12 = vector.broadcast %cst_7 : f32 to vector<16x1xf32>
    %13 = arith.mulf %12, %5 : vector<16x1xf32>
    %cst_8 = arith.constant 0.896774172 : f32
    %14 = vector.broadcast %cst_8 : f32 to vector<16x1xf32>
    %15 = arith.mulf %14, %11 : vector<16x1xf32>
    %16 = arith.addf %13, %15 : vector<16x1xf32>
    %cst_9 = arith.constant -0.668481708 : f32
    %17 = vector.broadcast %cst_9 : f32 to vector<16x1xf32>
    %18 = arith.subf %17, %16 : vector<16x1xf32>
    %cst_10 = arith.constant 0.000000e+00 : f32
    %19 = vector.broadcast %cst_10 : f32 to vector<16x1xf32>
    %20 = arith.cmpf ogt, %2, %19 : vector<16x1xf32>
    %21 = arith.mulf %18, %2 : vector<16x1xf32>
    %cst_11 = arith.constant 0.000000e+00 : f32
    %22 = vector.broadcast %cst_11 : f32 to vector<16x1xf32>
    %23 = arith.select %20, %21, %22 : vector<16x1xi1>, vector<16x1xf32>
    %24 = vector.shape_cast %23 : vector<16x1xf32> to vector<1x16x1xf32>
    %cst_12 = arith.constant dense<0.000000e+00> : vector<1xf32>
    %25 = vector.multi_reduction <add>, %24, %cst_12 [1, 2] : vector<1x16x1xf32> to vector<1xf32>
    %26 = vector.shape_cast %25 : vector<1xf32> to vector<1x1x1xf32>
    %27 = vector.extract %26[0, 0, 0] : f32 from vector<1x1x1xf32>
    %28 = vector.broadcast %27 : f32 to vector<1x1xf32>
    %c0_13 = arith.constant 0 : index
    %c0_14 = arith.constant 0 : index
    %c0_15 = arith.constant 0 : index
    %29 = vector.load %arg4[%c0_13, %c0_14, %c0_15] : memref<1x1x1xf32, #tpu.memory_space<vmem>>, vector<1x1x1xf32>
    %30 = vector.shape_cast %29 : vector<1x1x1xf32> to vector<1x1xf32>
    %31 = vector.shape_cast %28 : vector<1x1xf32> to vector<1x1x1xf32>
    tpu.vector_store %arg4[%c0_13, %c0_14, %c0_15], %31 {strides = array<i32>} : memref<1x1x1xf32, #tpu.memory_space<vmem>>, vector<1x1x1xf32>,
    return
  }
  func.func @transform_0(%arg0: i32) -> (i32, i32) {
    %c0_i32 = arith.constant 0 : i32
    %c0_i32_0 = arith.constant 0 : i32
    return %arg0, %c0_i32 : i32, i32
  }
  func.func @transform_1(%arg0: i32) -> (i32, i32) {
    %c0_i32 = arith.constant 0 : i32
    %c0_i32_0 = arith.constant 0 : i32
    return %arg0, %c0_i32 : i32, i32
  }
  func.func @transform_2(%arg0: i32) -> (i32, i32) {
    %c0_i32 = arith.constant 0 : i32
    %c0_i32_0 = arith.constant 0 : i32
    return %arg0, %c0_i32 : i32, i32
  }
  func.func @transform_3(%arg0: i32) -> (i32, i32, i32) {
    %c0_i32 = arith.constant 0 : i32
    %c0_i32_0 = arith.constant 0 : i32
    %c0_i32_1 = arith.constant 0 : i32
    return %arg0, %c0_i32, %c0_i32_0 : i32, i32, i32
  }
}

</mosaic_0001>

<bundles_post_ra>
// kernel: tpu_custom_call.1
= control target key start
LH: loop header
LB: loop body
LE: loop exit
PB: predicated region body
PF: predicated region fallthrough
CT: control target
= control target key end

     0   :  { %vm23_vm0 = vcmask 261120   ;;  %v119_v2 = vmov 0   ;;  %s175_s0 = inlined_call_operand.vmem [shape: f32[16,32], index: 0, kind: input, shape index: {}]   ;;  %s176_s1 = inlined_call_operand.vmem [shape: s32[16,1], index: 1, kind: input, shape index: {}]   ;;  %s177_s2 = inlined_call_operand.vmem [shape: f32[16,1], index: 2, kind: input, shape index: {}]   ;;  %s178_s3 = inlined_call_operand.hbm [shape: f32[1,1,1], index: 3, kind: output, shape index: {}]  }
   0x1   :  { %v17_v0 = vld [vmem:[%s176_s1] sm:$0xff]  ;;  %94 = vset.pattern.permute.xlu0 %v119_v2 }
   0x2   :  { %v15_v1 = vld [vmem:[%s175_s0] sm:$0xff] }
   0x3   :  { %v24_v3 = vsel %vm23_vm0, %v15_v1, 0.0 }
   0x4   :  { %8 = vsyncpa [#allocation3], 0  ;;  %31 = vperm.xlu0 %94, %v17_v0   ;;  %25 = vadd.xlane.f32.xlu1 %v24_v3  ;;  %v18_v4 = vld [vmem:[%s176_s1 + $0x8] sm:$0xff]  ;;  %v21_v7 = vlaneseq  ;;  %v19_v21 = vld [vmem:[%s177_s2] sm:$0xff]  ;;  %vm60_vm5 = vcmask 7168   ;;  %vm74_vm6 = vcmask 0  }
   0x5   :  { %v16_v5 = vld [vmem:[%s175_s0 + $0x8] sm:$0xff]  ;;  %vm54_vm3 = vcmp.gt.f32.partialorder %v19_v21, 0.0 }
   0x6   :  { %v27_v6 = vsel %vm23_vm0, %v16_v5, 0.0  ;;  %v22_v8 = vand.u32 127, %v21_v7  ;;  %v20_v27 = vld [vmem:[%s177_s2 + $0x8] sm:$0xff]  ;;  %s120_s2 = smov [#allocation2]  }
   0x7   :  { %vm55_vm4 = vcmp.gt.f32.partialorder %v20_v27, 0.0  ;;  %s82_s22 = sshll.u32 %s120_s2, 4  ;;  %s83_s22 = int_to_ptr.vmem [resolvable:$true] %s82_s22 }
   0x8   :  { %34 = vperm.xlu0 %94, %v18_v4   ;;  %28 = vadd.xlane.f32.xlu1 %v27_v6  ;;  %s95_s24 = scalar_lea.vmem %s83_s22, 16  ;;  %s99_s25 = scalar_lea.vmem %s83_s22, 32 }
   0x9   :  { %p96_p0 = scmp.ne.s32.totalorder %s83_s22, %s95_s24  ;;  %p100_p1 = scmp.lt.s32.totalorder %s83_s22, %s83_s22 }
   0xa   :  { %p101_p2 = scmp.lt.s32.totalorder %s99_s25, %s95_s24 }
   0xc   :  { %p102_p3 = por %p101_p2, %p100_p1 }
   0xe   :  { %p103_p4 = pnand %p102_p3, %p96_p0 }
  0x83   :  { %v32_v9 = vpop.permute.xlu0 %31 }
  0x84   :  { %vm36_vm1 = vcmp.eq.s32.totalorder %v22_v8, %v32_v9 }
  0x85   :  { %v38_v10 = vsel %vm36_vm1, %v15_v1, 0.0 }
  0x86   :  { %v40_v11 = vsel %vm23_vm0, %v38_v10, 0.0 }
  0x87   :  { %v35_v12 = vpop.permute.xlu0 %34  ;;  %41 = vadd.xlane.f32.xlu0 %v40_v11 }
  0x88   :  { %vm37_vm2 = vcmp.eq.s32.totalorder %v22_v8, %v35_v12 }
  0x89   :  { %v39_v13 = vsel %vm37_vm2, %v16_v5, 0.0 }
  0x8a   :  { %v43_v14 = vsel %vm23_vm0, %v39_v13, 0.0 }
  0x8b   :  { %44 = vadd.xlane.f32.xlu1 %v43_v14 }
  0x91   :  { %v26_v15 = vpop.xlane.xlu1 %25 }
  0x92   :  { %v46_v18 = vmul.f32 0.0032258064, %v26_v15 }
  0x95   :  { %v29_v16 = vpop.xlane.xlu1 %28 }
  0x96   :  { %v47_v24 = vmul.f32 0.0032258064, %v29_v16 }
 0x114   :  { %v42_v17 = vpop.xlane.xlu0 %41 }
 0x115   :  { %v48_v19 = vmul.f32 0.8967742, %v42_v17 }
 0x117   :  { %v50_v20 = vadd.f32 %v48_v19, %v46_v18 }
 0x118   :  { %v45_v22 = vpop.xlane.xlu1 %44 }
 0x119   :  { %v52_v23 = vsub.f32 -0.6684817, %v50_v20  ;;  %v49_v25 = vmul.f32 0.8967742, %v45_v22 }
 0x11b   :  { %v56_v26 = vmul.f32 %v52_v23, %v19_v21  ;;  %v51_v28 = vadd.f32 %v49_v25, %v47_v24 }
 0x11d   :  { %v53_v29 = vsub.f32 -0.6684817, %v51_v28  ;;  %v58_v31 = vsel %vm54_vm3, %v56_v26, 0.0 }
 0x11e   :  { %v61_v33 = vsel %vm60_vm5, %v58_v31, 0.0 }
 0x11f   :  { %v57_v30 = vmul.f32 %v53_v29, %v20_v27 }
 0x121   :  { %v59_v32 = vsel %vm55_vm4, %v57_v30, 0.0 }
 0x122   :  { %v62_v34 = vsel %vm60_vm5, %v59_v32, 0.0 }
 0x123   :  { %v63_v35 = vadd.f32 %v62_v34, %v61_v33 }
 0x125   :  { %64 = vadd.xlane.f32.xlu1 %v63_v35 }
 0x1b2   :  { %v65_v36 = vpop.xlane.xlu1 %64 }
 0x1b3   :  { %v66_v37 = vrot.slane %v65_v36, 4 }
 0x1b5   :  { %v67_v38 = vadd.f32 %v66_v37, %v65_v36 }
 0x1b7   :  { %v68_v39 = vrot.slane %v67_v38, 2 }
 0x1b9   :  { %v69_v40 = vadd.f32 %v68_v39, %v67_v38 }
 0x1bb   :  { %v70_v41 = vrot.slane %v69_v40, 1 }
 0x1bd   :  { %v71_v42 = vadd.f32 %v70_v41, %v69_v40 }
 0x1bf   :  { %90 = vpush %v71_v42 }
 0x1f0   :  { %s91_s23 = spop %90 }
 0x1f1   :  { %v73_v43 = vstv %s91_s23 }
 0x1f2   :  { %75 = vst.msk [vmem:[#allocation2] sm:$0x1] %vm74_vm6, %v73_v43 }
 0x1f3   :  { %106 = shalt.err (!%p103_p4)
}
 0x1f4   :  { %s107_s28 = scalar_lea.hbm %s178_s3, 16 }
 0x1f5   :  { %p108_p5 = scmp.ne.s32.totalorder %s178_s3, %s107_s28  ;;  %p111_p6 = scmp.lt.u32.totalorder %s107_s28, %s178_s3 }
 0x1f7   :  { %p113_p7 = pnand %p111_p6, %p108_p5 }
 0x1f9   :  { %116 = shalt.err (!%p113_p7)
}
 0x1fa   :  { %85 = dma.vmem_to_hbm [thread:$0]  %s83_s22, 16, %s178_s3, [#allocation3]  }
 0x1fb   :  { %117 = dma.done.wait [#allocation3], 16  }
 0x1fc   :  { %118 = vsyncadd [#allocation3], 4294967280 }
 0x1fd   :  { %89 = vsyncpa [#allocation3], 1 }

</bundles_post_ra>
